<compile_context>
chip_gen: v6e
topology: v6e:2x2x1
jax: 0.10.0
libtpu: 0.0.40
codegen_flags: <defaults>
</compile_context>

<pallas_src>
import math

import jax
import jax.numpy as jnp
from jax.experimental import pallas as pl
from jax.experimental.pallas import tpu as pltpu


# --------------------------- MLP seed kernel ------------------------------- #
def _mlp_kernel(xT_ref, w1T_ref, b1_ref, w2T_ref, b2_ref, zT_ref):
    # zT = (relu(x @ W1 + b1) @ W2 + b2)^T on one lane-dense node tile.
    h = jnp.dot(w1T_ref[...], xT_ref[...],
                preferred_element_type=jnp.float32) + b1_ref[...]
    h = jnp.maximum(h, 0.0)
    zT_ref[...] = jnp.dot(w2T_ref[...], h.astype(jnp.bfloat16),
                          preferred_element_type=jnp.float32) + b2_ref[...]


def _mlp_forward(xT, w1T, b1c, w2T, b2c, *, tn):
    F, N = xT.shape
    H = w1T.shape[0]
    C = w2T.shape[0]
    return pl.pallas_call(
        _mlp_kernel,
        out_shape=jax.ShapeDtypeStruct((C, N), jnp.float32),
        grid=(N // tn,),
        in_specs=[
            pl.BlockSpec((F, tn), lambda i: (0, i)),    # xT column tile
            pl.BlockSpec((H, F), lambda i: (0, 0)),     # W1^T (resident)
            pl.BlockSpec((H, 1), lambda i: (0, 0)),     # b1
            pl.BlockSpec((C, H), lambda i: (0, 0)),     # W2^T (resident)
            pl.BlockSpec((C, 1), lambda i: (0, 0)),     # b2
        ],
        out_specs=pl.BlockSpec((C, tn), lambda i: (0, i)),
        compiler_params=pltpu.CompilerParams(
            dimension_semantics=("parallel",)),
    )(xT, w1T, b1c, w2T, b2c)


# ------------------------ Bernstein propagation kernel ---------------------- #
def _make_prop_kernel(C, tn, n_tiles, lh_resident):
    single_tile = (n_tiles == 1)

    def kernel(coef_ref,                 # SMEM [K+1] f32 (scalar prefetch)
               zT_ref,                   # [C, N]  f32 MLP seed (resident)
               lh_ref,                   # [N, N] (resident) or [N, tn] bf16 tile of L/2
               out_ref,                  # [C, tn] f32
               state_bf,                 # [2, 2C, N] bf16: rows 0..C-1 = lz, C..2C-1 = res
               res_f32):                 # [2, C, N]  f32 Horner carry
        m = pl.program_id(0)             # serial Bernstein / Horner step
        j = pl.program_id(1)             # column tile of L/2
        col = pl.multiple_of(j * tn, tn)
        slot = m % 2                     # read slot
        nxt = 1 - slot                   # write slot

        # ---- step 0, tile 0: seed slot 0 with [lz_0 ; res_0] = [z ; c_0 z] ----
        @pl.when(jnp.logical_and(m == 0, j == 0))
        def _seed():
            z = zT_ref[...]                                       # [C, N] f32
            r0 = coef_ref[0] * z
            state_bf[0] = jnp.concatenate([z, r0], axis=0).astype(jnp.bfloat16)
            res_f32[0] = r0

        if lh_resident and not single_tile:
            lh_tile = lh_ref[:, pl.ds(col, tn)]                   # [N, tn] bf16
        else:
            lh_tile = lh_ref[...]                                 # [N, tn] bf16

        # One fused MXU dot per tile: [2C, N] @ [N, tn] -> [2C, tn] f32.
        prod = jnp.dot(state_bf[slot], lh_tile,
                       preferred_element_type=jnp.float32)
        new_lz = prod[:C, :]                                      # lz  @ (L/2)
        res_dot = prod[C:, :]                                     # res @ (L/2)

        # res @ (2I-L)/2 = res - res @ (L/2): identity term stays f32.
        if single_tile:
            old_res = res_f32[slot]
        else:
            old_res = res_f32[slot, :, pl.ds(col, tn)]
        new_res = old_res - res_dot + coef_ref[m + 1] * new_lz

        packed = jnp.concatenate([new_lz, new_res], axis=0).astype(jnp.bfloat16)
        if single_tile:
            state_bf[nxt] = packed
            res_f32[nxt] = new_res
        else:
            state_bf[nxt, :, pl.ds(col, tn)] = packed
            res_f32[nxt, :, pl.ds(col, tn)] = new_res

        # ---- last step: log_softmax over classes (sublane axis), emit the
        #      lane-dense [C, tn] output tile.  (Out index_map ignores m, so
        #      earlier steps write stale bytes that the final serial step
        #      overwrites — correct on the strictly sequential step axis.) ----
        @pl.when(m == pl.num_programs(0) - 1)
        def _finalize():
            mx = jnp.max(new_res, axis=0, keepdims=True)
            lse = mx + jnp.log(jnp.sum(jnp.exp(new_res - mx),
                                       axis=0, keepdims=True))
            out_ref[...] = new_res - lse

    return kernel


# ------------------------------- wrapper ----------------------------------- #
def bernnet_forward(x, w1, b1, w2, b2, adj_norm, temp, *, K, tn=None):
    N, F = x.shape
    H = w1.shape[1]
    C = w2.shape[1]
    assert K >= 1

    if tn is None:
        tn = next(t for t in (512, 384, 256, 128) if N % t == 0)
    assert N % tn == 0 and tn % 128 == 0
    n_tiles = N // tn

    # Bernstein coefficients c_k = relu(temp_k) * C(K, k); the 1/2^K factor is
    # folded into L/2 below (spectrum in [0, 1] keeps bf16 well conditioned).
    theta = jnp.maximum(temp.astype(jnp.float32), 0.0)
    binom = jnp.array([math.comb(K, k) for k in range(K + 1)], jnp.float32)
    coeffs = binom * theta                                        # -> SMEM

    # L/2 = (I - D^-1/2 A D^-1/2) / 2; (2I - L)/2 = I - L/2 is applied via the
    # identity-minus trick inside the kernel, so this is the only N x N matrix.
    lh = (0.5 * (jnp.eye(N, dtype=jnp.float32) - adj_norm)).astype(jnp.bfloat16)

    # Lane-dense transposed operands (nodes on the 128-lane axis), bf16 for MXU.
    xT = x.T.astype(jnp.bfloat16)
    w1T = w1.T.astype(jnp.bfloat16)
    w2T = w2.T.astype(jnp.bfloat16)
    b1c = b1.reshape(H, 1).astype(jnp.float32)
    b2c = b2.reshape(C, 1).astype(jnp.float32)

    # MLP seed z^T = [C, N] (separate tiny kernel; negligible FLOPs).
    zT = _mlp_forward(xT, w1T, b1c, w2T, b2c, tn=tn)

    # -------- per-generation VMEM budget & L/2 residency decision --------
    try:
        vmem_cap = int(pltpu.get_tpu_info().vmem_capacity_bytes)
    except Exception:
        vmem_cap = 64 * 1024 * 1024         # conservative (v7x per-core VMEM)
    budget = int(0.75 * vmem_cap)           # ~96 MiB v5e/v6e, ~48 MiB v7x

    state_bytes = 2 * (2 * C) * N * 2 + 2 * C * N * 4     # bf16 slab + f32 carry
    fixed_bytes = 2 * C * N * 4 + 2 * C * tn * 4 + (2 << 20)  # zT, out bufs, slack
    resident_lh_bytes = 2 * N * N * 2       # default double-buffer of the block
    stream_lh_bytes = 2 * N * tn * 2
    lh_resident = state_bytes + fixed_bytes + resident_lh_bytes <= budget
    lh_bytes = resident_lh_bytes if lh_resident else stream_lh_bytes
    vmem_limit = int(min(max(state_bytes + fixed_bytes + lh_bytes,
                             32 * 1024 * 1024), budget))

    if lh_resident:
        # Constant index_map => fetched from HBM once, kept in VMEM for all K
        # steps.  (pipeline_mode=pl.Buffered(1) would drop the second buffer
        # and roughly double the residency threshold.)
        lh_spec = pl.BlockSpec((N, N), lambda m, j, c: (0, 0))
    else:
        lh_spec = pl.BlockSpec((N, tn), lambda m, j, c: (0, j))

    cost = pl.CostEstimate(
        flops=int(2 * K * (2 * C) * N * N),
        transcendentals=int(N * (C + 1)),
        bytes_accessed=int((1 if lh_resident else K) * N * N * 2
                           + 2 * C * N * 4 + (K + 1) * 4),
    )

    kernel = _make_prop_kernel(C, tn, n_tiles, lh_resident)

    out_t = pl.pallas_call(
        kernel,
        out_shape=jax.ShapeDtypeStruct((C, N), jnp.float32),
        grid_spec=pltpu.PrefetchScalarGridSpec(
            num_scalar_prefetch=1,                        # coeffs -> SMEM
            grid=(K, n_tiles),                            # (serial step, column tile)
            in_specs=[
                pl.BlockSpec((C, N), lambda m, j, c: (0, 0)),   # zT (resident)
                lh_spec,                                        # L/2
            ],
            out_specs=pl.BlockSpec((C, tn), lambda m, j, c: (0, j)),
            scratch_shapes=[
                pltpu.VMEM((2, 2 * C, N), jnp.bfloat16),  # [lz ; res] matmul slab
                pltpu.VMEM((2, C, N), jnp.float32),       # f32 Horner carry
            ],
        ),
        compiler_params=pltpu.CompilerParams(
            # Step axis m carries state; j tiles within a step share that state,
            # so both stay "arbitrary" on a single core.
            dimension_semantics=("arbitrary", "arbitrary"),
            vmem_limit_bytes=vmem_limit,
        ),
        cost_estimate=cost,
    )(coeffs, zT, lh)

    return out_t.T                                        # back to [N, C]


# ------------------------------ JAX reference ------------------------------ #
def bernnet_reference(x, w1, b1, w2, b2, adj_norm, temp, *, K):
    """Pure-JAX f32 reference mirroring the PyTorch BernNet / Bern_prop loops."""
    h = jnp.maximum(x @ w1 + b1, 0.0)
    z = h @ w2 + b2
    theta = jnp.maximum(temp, 0.0)                        # F.relu(self.temp)
    n = x.shape[0]
    lap = jnp.eye(n, dtype=jnp.float32) - adj_norm        # get_laplacian(sym)
    two_i_minus_l = 2.0 * jnp.eye(n, dtype=jnp.float32) - lap
    tmp = [z]
    cur = z
    for _ in range(K):
        cur = two_i_minus_l @ cur
        tmp.append(cur)
    out = (math.comb(K, 0) / 2.0 ** K) * theta[0] * tmp[K]
    for i in range(K):
        v = tmp[K - i - 1]
        for _ in range(i + 1):
            v = lap @ v
        out = out + (math.comb(K, i + 1) / 2.0 ** K) * theta[i + 1] * v
    return jax.nn.log_softmax(out, axis=1)


# --------------------------------- setup ----------------------------------- #
def build_sym_norm_adjacency(edge_index, num_nodes):
    """Dense symmetric D^-1/2 A D^-1/2 (no self loops); plain-JAX glue."""
    src, dst = edge_index[0], edge_index[1]
    a = jnp.zeros((num_nodes, num_nodes), jnp.float32).at[src, dst].set(1.0)
    a = jnp.maximum(a, a.T)                                    # undirected
    a = a * (1.0 - jnp.eye(num_nodes, dtype=jnp.float32))      # drop self loops
    deg = jnp.sum(a, axis=1)
    d_inv_sqrt = jnp.where(deg > 0.0, 1.0 / jnp.sqrt(deg), 0.0)
    return a * d_inv_sqrt[:, None] * d_inv_sqrt[None, :]


if __name__ == "__main__":
    N, F_IN, HIDDEN, N_CLASSES = 256, 16, 32, 8
    K, E = 4, 1024

    key = jax.random.PRNGKey(0)
    kx, ke, k1, k2, k3, k4, kt = jax.random.split(key, 7)

    x = jax.random.normal(kx, (N, F_IN), jnp.float32)
    edge_index = jax.random.randint(ke, (2, E), 0, N, dtype=jnp.int32)
    adj_norm = build_sym_norm_adjacency(edge_index, N)

    bound1 = 1.0 / math.sqrt(F_IN)
    bound2 = 1.0 / math.sqrt(HIDDEN)
    w1 = jax.random.uniform(k1, (F_IN, HIDDEN), jnp.float32, -bound1, bound1)
    b1 = jax.random.uniform(k2, (HIDDEN,), jnp.float32, -bound1, bound1)
    w2 = jax.random.uniform(k3, (HIDDEN, N_CLASSES), jnp.float32, -bound2, bound2)
    b2 = jax.random.uniform(k4, (N_CLASSES,), jnp.float32, -bound2, bound2)

    # Bern_prop.reset_parameters fills temp with 1; use a mixed-sign vector so
    # the in-forward F.relu(temp) and distinct Bernstein terms are exercised.
    temp = jax.random.uniform(kt, (K + 1,), jnp.float32, -0.5, 1.5)

    out = bernnet_forward(x, w1, b1, w2, b2, adj_norm, temp, K=K)
    out = jax.block_until_ready(out)

    ref = bernnet_reference(x, w1, b1, w2, b2, adj_norm, temp, K=K)
    assert out.shape == (N, N_CLASSES)
    # bf16 MXU operands (f32 accumulation / f32 Horner carry) vs. all-f32 ref.
    assert jnp.allclose(out, ref, atol=5e-2, rtol=5e-2), float(
        jnp.max(jnp.abs(out - ref)))

    print("KERNEL_OK")
</pallas_src>

<mosaic_0001>
module attributes {stable_mosaic.version = 11 : i64} {
  func.func @_mlp_kernel(%arg0: i32, %arg1: memref<16x256xbf16, #tpu.memory_space<vmem>>, %arg2: memref<32x16xbf16, #tpu.memory_space<vmem>>, %arg3: memref<32x1xf32, #tpu.memory_space<vmem>>, %arg4: memref<8x32xbf16, #tpu.memory_space<vmem>>, %arg5: memref<8x1xf32, #tpu.memory_space<vmem>>, %arg6: memref<8x256xf32, #tpu.memory_space<vmem>>) attributes {dimension_semantics = [#tpu.dimension_semantics<parallel>], iteration_bounds = array<i64: 1>, scalar_prefetch = 0 : i64, scratch_operands = 0 : i64, tpu.core_type = #tpu.core_type<tc>, window_params = [{transform_indices = @transform_0, window_bounds = array<i64: 16, 256>}, {pipeline_mode = #tpu.pipeline_mode<synchronous>, transform_indices = @transform_1, window_bounds = array<i64: 32, 16>}, {pipeline_mode = #tpu.pipeline_mode<synchronous>, transform_indices = @transform_2, window_bounds = array<i64: 32, 1>}, {pipeline_mode = #tpu.pipeline_mode<synchronous>, transform_indices = @transform_3, window_bounds = array<i64: 8, 32>}, {pipeline_mode = #tpu.pipeline_mode<synchronous>, transform_indices = @transform_4, window_bounds = array<i64: 8, 1>}, {transform_indices = @transform_5, window_bounds = array<i64: 8, 256>}]} {
    %c0 = arith.constant 0 : index
    %c0_0 = arith.constant 0 : index
    %0 = vector.load %arg2[%c0, %c0_0] : memref<32x16xbf16, #tpu.memory_space<vmem>>, vector<32x16xbf16>
    %c0_1 = arith.constant 0 : index
    %c0_2 = arith.constant 0 : index
    %1 = vector.load %arg1[%c0_1, %c0_2] : memref<16x256xbf16, #tpu.memory_space<vmem>>, vector<16x256xbf16>
    %cst = arith.constant dense<0.000000e+00> : vector<32x256xf32>
    %2 = tpu.matmul %0, %1, %cst {dimension_numbers = #tpu.dot_dimension_numbers<[1], [0], [0], [1], [0, 0, 1, 1], [], []>} : vector<32x16xbf16>, vector<16x256xbf16>, vector<32x256xf32> -> vector<32x256xf32>
    %c0_3 = arith.constant 0 : index
    %c0_4 = arith.constant 0 : index
    %3 = vector.load %arg3[%c0_3, %c0_4] : memref<32x1xf32, #tpu.memory_space<vmem>>, vector<32x1xf32>
    %4 = vector.broadcast %3 : vector<32x1xf32> to vector<32x256xf32>
    %5 = arith.addf %2, %4 : vector<32x256xf32>
    %cst_5 = arith.constant 0.000000e+00 : f32
    %6 = vector.broadcast %cst_5 : f32 to vector<32x256xf32>
    %7 = arith.maximumf %5, %6 : vector<32x256xf32>
    %c0_6 = arith.constant 0 : index
    %c0_7 = arith.constant 0 : index
    %8 = vector.load %arg4[%c0_6, %c0_7] : memref<8x32xbf16, #tpu.memory_space<vmem>>, vector<8x32xbf16>
    %9 = arith.truncf %7 : vector<32x256xf32> to vector<32x256xbf16>
    %cst_8 = arith.constant dense<0.000000e+00> : vector<8x256xf32>
    %10 = tpu.matmul %8, %9, %cst_8 {dimension_numbers = #tpu.dot_dimension_numbers<[1], [0], [0], [1], [0, 0, 1, 1], [], []>} : vector<8x32xbf16>, vector<32x256xbf16>, vector<8x256xf32> -> vector<8x256xf32>
    %c0_9 = arith.constant 0 : index
    %c0_10 = arith.constant 0 : index
    %11 = vector.load %arg5[%c0_9, %c0_10] : memref<8x1xf32, #tpu.memory_space<vmem>>, vector<8x1xf32>
    %12 = vector.broadcast %11 : vector<8x1xf32> to vector<8x256xf32>
    %13 = arith.addf %10, %12 : vector<8x256xf32>
    %c0_11 = arith.constant 0 : index
    %c0_12 = arith.constant 0 : index
    %14 = vector.load %arg6[%c0_11, %c0_12] : memref<8x256xf32, #tpu.memory_space<vmem>>, vector<8x256xf32>
    tpu.vector_store %arg6[%c0_11, %c0_12], %13 {strides = array<i32>} : memref<8x256xf32, #tpu.memory_space<vmem>>, vector<8x256xf32>,
    return
  }
  func.func @transform_0(%arg0: i32) -> (i32, i32) {
    %c0_i32 = arith.constant 0 : i32
    %c0_i32_0 = arith.constant 0 : i32
    return %c0_i32, %arg0 : i32, i32
  }
  func.func @transform_1(%arg0: i32) -> (i32, i32) {
    %c0_i32 = arith.constant 0 : i32
    %c0_i32_0 = arith.constant 0 : i32
    %c0_i32_1 = arith.constant 0 : i32
    return %c0_i32, %c0_i32_0 : i32, i32
  }
  func.func @transform_2(%arg0: i32) -> (i32, i32) {
    %c0_i32 = arith.constant 0 : i32
    %c0_i32_0 = arith.constant 0 : i32
    %c0_i32_1 = arith.constant 0 : i32
    return %c0_i32, %c0_i32_0 : i32, i32
  }
  func.func @transform_3(%arg0: i32) -> (i32, i32) {
    %c0_i32 = arith.constant 0 : i32
    %c0_i32_0 = arith.constant 0 : i32
    %c0_i32_1 = arith.constant 0 : i32
    return %c0_i32, %c0_i32_0 : i32, i32
  }
  func.func @transform_4(%arg0: i32) -> (i32, i32) {
    %c0_i32 = arith.constant 0 : i32
    %c0_i32_0 = arith.constant 0 : i32
    %c0_i32_1 = arith.constant 0 : i32
    return %c0_i32, %c0_i32_0 : i32, i32
  }
  func.func @transform_5(%arg0: i32) -> (i32, i32) {
    %c0_i32 = arith.constant 0 : i32
    %c0_i32_0 = arith.constant 0 : i32
    return %c0_i32, %arg0 : i32, i32
  }
}

</mosaic_0001>

<bundles_post_ra>
// kernel: tpu_custom_call.1
= control target key start
LH: loop header
LB: loop body
LE: loop exit
PB: predicated region body
PF: predicated region fallthrough
CT: control target
= control target key end

     0   :  { %v250_v2 = vmov 0   ;;  %vm72_vm0 = vcmask 130048   ;;  %s317_s0 = inlined_call_operand.vmem [shape: bf16[16,256], index: 0, kind: input, shape index: {}]   ;;  %s318_s1 = inlined_call_operand.vmem [shape: bf16[32,16], index: 1, kind: input, shape index: {}]   ;;  %s319_s2 = inlined_call_operand.vmem [shape: f32[32,1], index: 2, kind: input, shape index: {}]   ;;  %s320_s3 = inlined_call_operand.vmem [shape: bf16[8,32], index: 3, kind: input, shape index: {}]   ;;  %s321_s4 = inlined_call_operand.vmem [shape: f32[8,1], index: 4, kind: input, shape index: {}]   ;;  %s322_s5 = inlined_call_operand.hbm [shape: f32[8,256], index: 5, kind: output, shape index: {}]  }
   0x1   :  { %v223_v0 = vld [vmem:[%s317_s0 + $0x4] ss:$8 sps:$4 sm:$0xff]   ;;  %v225_v1 = vld [vmem:[%s317_s0] ss:$8 sps:$4 sm:$0xff]   ;;  %111 = vmatprep.mubr.bf16.mxu0 %v250_v2  ;;  %222 = vset.pattern.permute.xlu1 %v250_v2  ;;  %v30_v5 = vld [vmem:[%s319_s2 + $0x10] sm:$0xff] }
   0x2   :  { %93 = vmatprep.subr.bf16.mxu0 %v223_v0  ;;  %v226_v3 = vld [vmem:[%s318_s1] sm:$0xff]   ;;  %221 = vset.pattern.permute.xlu0 %v250_v2  ;;  %v29_v6 = vld [vmem:[%s319_s2 + $0x8] sm:$0xff]  ;;  %v31_v7 = vld [vmem:[%s319_s2 + $0x18] sm:$0xff] }
   0x3   :  { %94 = vmatpush1.bf16.msra.mxu0 %v225_v1  ;;  %v28_v4 = vld [vmem:[%s319_s2] sm:$0xff]  ;;  %187 = vmatprep.mubr.bf16.mxu1 %v250_v2 }
   0x4   :  { %34 = vperm.xlu1 %222, %v28_v4   ;;  %44 = vperm.xlu0 %221, %v30_v5  }
   0x5   :  { %10 = vsyncpa [#allocation3], 0  ;;  %v145_v8 = vld [vmem:[%s321_s4] sm:$0xff]  ;;  %v227_v9 = vld [vmem:[%s318_s1 + $0x8] sm:$0xff]   ;;  %vm151_vm1 = vcmask 261120   ;;  %s251_s4 = smov [#allocation2]  }
   0x6   :  { %216 = vmatmul.mubr.msk.bf16.vlgmr.msra.gmra.mxu0 %vm72_vm0, %v226_v3  ;;  %v140_v42 = vld [vmem:[%s320_s3] sm:$0xf]  ;;  %s204_s10 = sshll.u32 %s251_s4, 4  ;;  %s205_s10 = int_to_ptr.vmem [resolvable:$true] %s204_s10 }
   0x7   :  { %121 = vmatprep.mubr.bf16.mxu0 %v250_v2  ;;  %s228_s11 = scalar_lea.vmem %s205_s10, 256  ;;  %p233_p1 = scmp.lt.s32.totalorder %s205_s10, %s205_s10 }
   0x8   :  { %39 = vperm.xlu1 %222, %v29_v6   ;;  %49 = vperm.xlu0 %221, %v31_v7   ;;  %p229_p0 = scmp.ne.s32.totalorder %s205_s10, %s228_s11  ;;  %p234_p2 = scmp.lt.s32.totalorder %s228_s11, %s228_s11 }
   0xa   :  { %p235_p3 = por %p234_p2, %p233_p1 }
   0xc   :  { %148 = vperm.xlu0 %221, %v145_v8   ;;  %p236_p4 = pnand %p235_p3, %p229_p0 }
   0xe   :  { %217 = vmatmul.mubr.msk.bf16.gmra.mxu0 %vm72_vm0, %v227_v9 }
  0x7f   :  { %v35_v13 = vpop.permute.xlu1 %34  ;;  %v45_v14 = vpop.permute.xlu0 %44 }
  0x83   :  { %v40_v18 = vpop.permute.xlu1 %39  ;;  %v50_v19 = vpop.permute.xlu0 %49 }
  0x87   :  { %v149_v43 = vpop.permute.xlu0 %148 }
  0xc6   :  { %v113_v10 = vpop.f32.mrf.mxu0 }
  0xc7   :  { %v114_v33 = vadd.f32 %v113_v10, %v35_v13 }
  0xc8   :  { %v115_v11 = vpop.f32.mrf.mxu0 }
  0xc9   :  { %v116_v26 = vadd.f32 %v115_v11, %v35_v13  ;;  %v132_v40 = vmax.f32 %v114_v33, 0.0 }
  0xca   :  { %v117_v12 = vpop.f32.mrf.mxu0 }
  0xcb   :  { %v118_v28 = vadd.f32 %v117_v12, %v40_v18  ;;  %v133_v35 = vmax.f32 %v116_v26, 0.0 }
  0xcc   :  { %v119_v15 = vpop.f32.mrf.mxu0 }
  0xcd   :  { %v120_v21 = vadd.f32 %v119_v15, %v40_v18  ;;  %v134_v37 = vmax.f32 %v118_v28, 0.0 }
  0xce   :  { %v123_v16 = vpop.f32.mrf.mxu0 }
  0xcf   :  { %v124_v24 = vadd.f32 %v123_v16, %v45_v14  ;;  %v135_v30 = vmax.f32 %v120_v21, 0.0  ;;  %v141_v41 = vpack.c.bf16 %v134_v37, %v132_v40 }
  0xd0   :  { %v125_v17 = vpop.f32.mrf.mxu0 }
  0xd1   :  { %v126_v22 = vadd.f32 %v125_v17, %v45_v14  ;;  %v136_v34 = vmax.f32 %v124_v24, 0.0  ;;  %v142_v39 = vpack.c.bf16 %v135_v30, %v133_v35 }
  0xd2   :  { %v127_v20 = vpop.f32.mrf.mxu0 }
  0xd3   :  { %v128_v23 = vadd.f32 %v127_v20, %v50_v19  ;;  %v137_v31 = vmax.f32 %v126_v22, 0.0 }
  0xd4   :  { %v129_v25 = vpop.f32.mrf.mxu0 }
  0xd5   :  { %v130_v27 = vadd.f32 %v129_v25, %v50_v19  ;;  %v138_v29 = vmax.f32 %v128_v23, 0.0 }
  0xd7   :  { %v139_v32 = vmax.f32 %v130_v27, 0.0  ;;  %v143_v38 = vpack.c.bf16 %v138_v29, %v136_v34 }
  0xd9   :  { %v144_v36 = vpack.c.bf16 %v139_v32, %v137_v31 }
  0xdb   :  { %167 = vmatprep.subr.bf16.mxu1 %v144_v36 }
  0xdc   :  { %168 = vmatpush1.bf16.msra.mxu1 %v143_v38 }
  0xdd   :  { %169 = vmatprep.subr.bf16.mxu1 %v142_v39 }
  0xe0   :  { %170 = vmatpush1.bf16.msra.mxu1 %v141_v41 }
  0xe3   :  { %218 = vmatmul.mubr.msk.bf16.vlgmr.msra.gmra.mxu1 %vm151_vm1, %v140_v42 }
 0x1a3   :  { %v189_v44 = vpop.f32.mrf.mxu1 }
 0x1a4   :  { %v190_v45 = vadd.f32 %v189_v44, %v149_v43 }
 0x1a5   :  { %v191_v46 = vpop.f32.mrf.mxu1 }
 0x1a6   :  { %196 = vst [vmem:[#allocation2] sm:$0xff] %v190_v45  ;;  %v192_v47 = vadd.f32 %v191_v46, %v149_v43 }
 0x1a7   :  { %v193_v48 = vpop.f32.mrf.mxu1 }
 0x1a8   :  { %197 = vst [vmem:[#allocation2 + $0x8] sm:$0xff] %v192_v47 }
 0x1a9   :  { %v194_v49 = vpop.f32.mrf.mxu1 }
 0x1aa   :  { %239 = shalt.err (!%p236_p4)
}
 0x1ab   :  { %207 = dma.vmem_to_hbm [thread:$0]  %s205_s10, 256, %s322_s5, [#allocation3]  }
 0x1ac   :  { %248 = dma.done.wait [#allocation3], 256  }
 0x1ad   :  { %249 = vsyncadd [#allocation3], 4294967040 }
 0x1ae   :  { %211 = vsyncpa [#allocation3], 1 }

</bundles_post_ra>
